<compile_context>
chip_gen: v7x
topology: tpu7x:2x2x1
jax: 0.10.0
libtpu: 0.0.40
codegen_flags: <defaults>
</compile_context>

<pallas_src>
import jax
import jax.numpy as jnp
from jax.experimental import pallas as pl
from jax.experimental.pallas import tpu as pltpu


def _round_up(x, m):
    return ((x + m - 1) // m) * m


def walkroom_kernel(x_ref, w1_ref, b1_ref, w2_ref, b2_ref, o_ref):
    # x : (tile_b, nS)      bf16
    # w1: (nS, H_pad)       bf16   (zero in padded hidden columns)
    # b1: (1, H_pad)        f32    (zero in padded hidden lanes)
    # w2: (H_pad, nA_pad)   bf16   (zero in padded rows / columns)
    # b2: (1, nA_pad)       f32    (-1e30 in padded lanes)
    x = x_ref[...]

    # Linear(nS, 20) + Tanh   (bf16 MXU inputs, f32 accumulation/activation)
    h = jnp.dot(x, w1_ref[...], preferred_element_type=jnp.float32)
    h = jnp.tanh(h + b1_ref[...])                              # (tb, H_pad) f32

    # Linear(20, nA)
    logits = jnp.dot(h.astype(w2_ref.dtype), w2_ref[...],
                     preferred_element_type=jnp.float32) + b2_ref[...]

    # LogSoftmax(-1), numerically stable.  Padded lanes hold -1e30 -> exp ~ 0,
    # so the reduction equals the reduction over the real nA columns.
    m = jnp.max(logits, axis=-1, keepdims=True)
    z = logits - m
    lse = jnp.log(jnp.sum(jnp.exp(z), axis=-1, keepdims=True))
    o_ref[...] = (z - lse).astype(o_ref.dtype)


def walkroom_forward(state, w1, b1, w2, b2, *, block_b=512):
    """state: (B, nS) f32; w1: (nS, H); b1: (H,); w2: (H, nA); b2: (nA,)."""
    B, nS = state.shape
    hidden, nA = w2.shape
    compute_dtype = jnp.bfloat16

    # ---- pad hidden and classifier dims to lane-dense multiples of 128 ----
    H_pad = _round_up(hidden, 128)
    nA_pad = _round_up(nA, 128)
    w1_p = jnp.zeros((nS, H_pad), jnp.float32).at[:, :hidden].set(w1)
    b1_p = jnp.zeros((1, H_pad), jnp.float32).at[:, :hidden].set(b1)
    w2_p = jnp.zeros((H_pad, nA_pad), jnp.float32).at[:hidden, :nA].set(w2)
    b2_p = jnp.full((1, nA_pad), -1e30, jnp.float32).at[:, :nA].set(b2)

    # ---- batch tiling (tile rows multiple of 8; pad B if needed) ----
    tile_b = min(block_b, _round_up(B, 8))
    B_pad = _round_up(B, tile_b)
    x = state.astype(compute_dtype)
    if B_pad != B:
        x = jnp.zeros((B_pad, nS), compute_dtype).at[:B].set(x)

    grid = (pl.cdiv(B_pad, tile_b),)
    out = pl.pallas_call(
        walkroom_kernel,
        out_shape=jax.ShapeDtypeStruct((B_pad, nA_pad), jnp.float32),
        grid=grid,
        in_specs=[
            pl.BlockSpec((tile_b, nS), lambda i: (i, 0)),        # state tile
            pl.BlockSpec((nS, H_pad), lambda i: (0, 0)),         # w1 resident
            pl.BlockSpec((1, H_pad), lambda i: (0, 0)),          # b1 resident
            pl.BlockSpec((H_pad, nA_pad), lambda i: (0, 0)),     # w2 resident
            pl.BlockSpec((1, nA_pad), lambda i: (0, 0)),         # b2 resident
        ],
        out_specs=pl.BlockSpec((tile_b, nA_pad), lambda i: (i, 0)),
        compiler_params=pltpu.CompilerParams(
            dimension_semantics=("parallel",)),
    )(
        x,
        w1_p.astype(compute_dtype),
        b1_p,
        w2_p.astype(compute_dtype),
        b2_p,
    )
    return out[:B, :nA]


def init_params(key, nS, nA, hidden=20):
    """Deterministic init mimicking torch.nn.Linear default (U[-1/sqrt(fan_in), +])."""
    k1, k2, k3, k4 = jax.random.split(key, 4)
    lim1 = 1.0 / jnp.sqrt(jnp.float32(nS))
    lim2 = 1.0 / jnp.sqrt(jnp.float32(hidden))
    w1 = jax.random.uniform(k1, (nS, hidden), jnp.float32, -lim1, lim1)
    b1 = jax.random.uniform(k2, (hidden,), jnp.float32, -lim1, lim1)
    w2 = jax.random.uniform(k3, (hidden, nA), jnp.float32, -lim2, lim2)
    b2 = jax.random.uniform(k4, (nA,), jnp.float32, -lim2, lim2)
    return w1, b1, w2, b2


if __name__ == "__main__":
    key = jax.random.PRNGKey(0)
    kx, kp = jax.random.split(key)

    B, nS, nA = 8, 32, 4
    state = jax.random.normal(kx, (B, nS), jnp.float32)
    w1, b1, w2, b2 = init_params(kp, nS, nA)

    out = walkroom_forward(state, w1, b1, w2, b2)
    out = jax.block_until_ready(out)
    assert out.shape == (B, nA)

    # Reference 1: same bf16-matmul / f32-activation split as the kernel.
    xb = state.astype(jnp.bfloat16)
    h_ref = jnp.tanh(
        jnp.dot(xb, w1.astype(jnp.bfloat16),
                preferred_element_type=jnp.float32) + b1)
    logits_ref = jnp.dot(h_ref.astype(jnp.bfloat16), w2.astype(jnp.bfloat16),
                         preferred_element_type=jnp.float32) + b2
    ref_bf16 = jax.nn.log_softmax(logits_ref, axis=-1)
    assert jnp.allclose(out, ref_bf16, atol=2e-3), "mismatch vs bf16-matched reference"

    # Reference 2: full-f32 math (the exact PyTorch module semantics), looser tol
    # accounting for bf16 matmul operands.
    ref_f32 = jax.nn.log_softmax(jnp.tanh(state @ w1 + b1) @ w2 + b2, axis=-1)
    assert jnp.allclose(out, ref_f32, atol=5e-2), "mismatch vs f32 reference"

    print("KERNEL_OK")
</pallas_src>

<mosaic_0001>
module attributes {stable_mosaic.version = 11 : i64} {
  func.func @walkroom_kernel(%arg0: i32, %arg1: memref<8x32xbf16, #tpu.memory_space<vmem>>, %arg2: memref<32x128xbf16, #tpu.memory_space<vmem>>, %arg3: memref<1x128xf32, #tpu.memory_space<vmem>>, %arg4: memref<128x128xbf16, #tpu.memory_space<vmem>>, %arg5: memref<1x128xf32, #tpu.memory_space<vmem>>, %arg6: memref<8x128xf32, #tpu.memory_space<vmem>>) attributes {dimension_semantics = [#tpu.dimension_semantics<parallel>], iteration_bounds = array<i64: 1>, scalar_prefetch = 0 : i64, scratch_operands = 0 : i64, tpu.core_type = #tpu.core_type<tc>, window_params = [{transform_indices = @transform_0, window_bounds = array<i64: 8, 32>}, {pipeline_mode = #tpu.pipeline_mode<synchronous>, transform_indices = @transform_1, window_bounds = array<i64: 32, 128>}, {pipeline_mode = #tpu.pipeline_mode<synchronous>, transform_indices = @transform_2, window_bounds = array<i64: 1, 128>}, {pipeline_mode = #tpu.pipeline_mode<synchronous>, transform_indices = @transform_3, window_bounds = array<i64: 128, 128>}, {pipeline_mode = #tpu.pipeline_mode<synchronous>, transform_indices = @transform_4, window_bounds = array<i64: 1, 128>}, {transform_indices = @transform_5, window_bounds = array<i64: 8, 128>}]} {
    %c0 = arith.constant 0 : index
    %c0_0 = arith.constant 0 : index
    %0 = vector.load %arg1[%c0, %c0_0] : memref<8x32xbf16, #tpu.memory_space<vmem>>, vector<8x32xbf16>
    %c0_1 = arith.constant 0 : index
    %c0_2 = arith.constant 0 : index
    %1 = vector.load %arg2[%c0_1, %c0_2] : memref<32x128xbf16, #tpu.memory_space<vmem>>, vector<32x128xbf16>
    %cst = arith.constant dense<0.000000e+00> : vector<8x128xf32>
    %2 = tpu.matmul %0, %1, %cst {dimension_numbers = #tpu.dot_dimension_numbers<[1], [0], [0], [1], [0, 0, 1, 1], [], []>} : vector<8x32xbf16>, vector<32x128xbf16>, vector<8x128xf32> -> vector<8x128xf32>
    %c0_3 = arith.constant 0 : index
    %c0_4 = arith.constant 0 : index
    %3 = vector.load %arg3[%c0_3, %c0_4] : memref<1x128xf32, #tpu.memory_space<vmem>>, vector<1x128xf32>
    %4 = vector.broadcast %3 : vector<1x128xf32> to vector<8x128xf32>
    %5 = arith.addf %2, %4 : vector<8x128xf32>
    %6 = math.tanh %5 : vector<8x128xf32>
    %7 = arith.truncf %6 : vector<8x128xf32> to vector<8x128xbf16>
    %c0_5 = arith.constant 0 : index
    %c0_6 = arith.constant 0 : index
    %8 = vector.load %arg4[%c0_5, %c0_6] : memref<128x128xbf16, #tpu.memory_space<vmem>>, vector<128x128xbf16>
    %cst_7 = arith.constant dense<0.000000e+00> : vector<8x128xf32>
    %9 = tpu.matmul %7, %8, %cst_7 {dimension_numbers = #tpu.dot_dimension_numbers<[1], [0], [0], [1], [0, 0, 1, 1], [], []>} : vector<8x128xbf16>, vector<128x128xbf16>, vector<8x128xf32> -> vector<8x128xf32>
    %c0_8 = arith.constant 0 : index
    %c0_9 = arith.constant 0 : index
    %10 = vector.load %arg5[%c0_8, %c0_9] : memref<1x128xf32, #tpu.memory_space<vmem>>, vector<1x128xf32>
    %11 = vector.broadcast %10 : vector<1x128xf32> to vector<8x128xf32>
    %12 = arith.addf %9, %11 : vector<8x128xf32>
    %cst_10 = arith.constant dense<0xFF800000> : vector<8xf32>
    %13 = vector.multi_reduction <maximumf>, %12, %cst_10 [1] : vector<8x128xf32> to vector<8xf32>
    %14 = vector.shape_cast %13 : vector<8xf32> to vector<8x1xf32>
    %15 = vector.broadcast %14 : vector<8x1xf32> to vector<8x128xf32>
    %16 = arith.subf %12, %15 : vector<8x128xf32>
    %17 = math.exp %16 : vector<8x128xf32>
    %cst_11 = arith.constant dense<0.000000e+00> : vector<8xf32>
    %18 = vector.multi_reduction <add>, %17, %cst_11 [1] : vector<8x128xf32> to vector<8xf32>
    %19 = vector.shape_cast %18 : vector<8xf32> to vector<8x1xf32>
    %20 = math.log %19 : vector<8x1xf32>
    %21 = vector.broadcast %20 : vector<8x1xf32> to vector<8x128xf32>
    %22 = arith.subf %16, %21 : vector<8x128xf32>
    %c0_12 = arith.constant 0 : index
    %c0_13 = arith.constant 0 : index
    %23 = vector.load %arg6[%c0_12, %c0_13] : memref<8x128xf32, #tpu.memory_space<vmem>>, vector<8x128xf32>
    tpu.vector_store %arg6[%c0_12, %c0_13], %22 {strides = array<i32>} : memref<8x128xf32, #tpu.memory_space<vmem>>, vector<8x128xf32>,
    return
  }
  func.func @transform_0(%arg0: i32) -> (i32, i32) {
    %c0_i32 = arith.constant 0 : i32
    %c0_i32_0 = arith.constant 0 : i32
    return %arg0, %c0_i32 : i32, i32
  }
  func.func @transform_1(%arg0: i32) -> (i32, i32) {
    %c0_i32 = arith.constant 0 : i32
    %c0_i32_0 = arith.constant 0 : i32
    %c0_i32_1 = arith.constant 0 : i32
    return %c0_i32, %c0_i32_0 : i32, i32
  }
  func.func @transform_2(%arg0: i32) -> (i32, i32) {
    %c0_i32 = arith.constant 0 : i32
    %c0_i32_0 = arith.constant 0 : i32
    %c0_i32_1 = arith.constant 0 : i32
    return %c0_i32, %c0_i32_0 : i32, i32
  }
  func.func @transform_3(%arg0: i32) -> (i32, i32) {
    %c0_i32 = arith.constant 0 : i32
    %c0_i32_0 = arith.constant 0 : i32
    %c0_i32_1 = arith.constant 0 : i32
    return %c0_i32, %c0_i32_0 : i32, i32
  }
  func.func @transform_4(%arg0: i32) -> (i32, i32) {
    %c0_i32 = arith.constant 0 : i32
    %c0_i32_0 = arith.constant 0 : i32
    %c0_i32_1 = arith.constant 0 : i32
    return %c0_i32, %c0_i32_0 : i32, i32
  }
  func.func @transform_5(%arg0: i32) -> (i32, i32) {
    %c0_i32 = arith.constant 0 : i32
    %c0_i32_0 = arith.constant 0 : i32
    return %arg0, %c0_i32 : i32, i32
  }
}

</mosaic_0001>

<bundles_post_ra>
// kernel: tpu_custom_call.1
= control target key start
LH: loop header
LB: loop body
LE: loop exit
PB: predicated region body
PF: predicated region fallthrough
CT: control target
= control target key end

     0   :  { %10 = vsyncpa [#allocation3], 0  ;;  %s538_s0 = inlined_call_operand.hbm [shape: bf16[8,32], index: 0, kind: input, shape index: {}]   ;;  %s539_s1 = inlined_call_operand.hbm [shape: bf16[32,128], index: 1, kind: input, shape index: {}]   ;;  %s540_s2 = inlined_call_operand.vmem [shape: f32[1,128], index: 2, kind: input, shape index: {}]   ;;  %s541_s3 = inlined_call_operand.hbm [shape: bf16[128,128], index: 3, kind: input, shape index: {}]   ;;  %s542_s4 = inlined_call_operand.vmem [shape: f32[1,128], index: 4, kind: input, shape index: {}]   ;;  %s543_s5 = inlined_call_operand.hbm [shape: f32[8,128], index: 5, kind: output, shape index: {}]  }
   0x1   :  { %11 = vsyncpa [#allocation6], 0 }
   0x2   :  { %12 = vsyncpa [#allocation4], 0  ;;  %s440_s18 = smov [#allocation5]   ;;  %s346_s22 = scalar_lea.hbm %s539_s1, 256 }
   0x3   :  { %s28_s19 = sshll.u32 %s440_s18, 4  ;;  %p347_p0 = scmp.ne.s32.totalorder %s539_s1, %s346_s22  ;;  %s29_s19 = int_to_ptr.vmem [resolvable:$true] %s28_s19 }
   0x4   :  { %p350_p1 = scmp.lt.u32.totalorder %s346_s22, %s539_s1 }
   0x6   :  { %p352_p2 = pnand %p350_p1, %p347_p0 }
   0x8   :  { %355 = shalt.err (!%p352_p2)
}
   0x9   :  { %s356_s27 = scalar_lea.vmem %s29_s19, 256  ;;  %p361_p4 = scmp.lt.s32.totalorder %s29_s19, %s29_s19 }
   0xa   :  { %p357_p3 = scmp.ne.s32.totalorder %s29_s19, %s356_s27  ;;  %p362_p5 = scmp.lt.s32.totalorder %s356_s27, %s356_s27 }
   0xc   :  { %p363_p6 = por %p362_p5, %p361_p4 }
   0xe   :  { %p364_p7 = pnand %p363_p6, %p357_p3 }
  0x10   :  { %367 = shalt.err (!%p364_p7)
}
  0x11   :  { %s441_s28 = smov 64   ;;  %s442_s29 = smov 4  }
  0x12   :  { %34 = dma.hbm_to_vmem [thread:$0]  %s539_s1, 256, %s29_s19, [#allocation6], %s441_s28, %s441_s28, %s442_s29  }
  0x13   :  { %s443_s7 = smov [#allocation2]   ;;  %s444_s9 = smov [#allocation7]  }
  0x14   :  { %s19_s8 = sshll.u32 %s443_s7, 4  ;;  %s42_s10 = sshll.u32 %s444_s9, 4  ;;  %s20_s8 = int_to_ptr.vmem [resolvable:$true] %s19_s8  ;;  %s43_s10 = int_to_ptr.vmem [resolvable:$true] %s42_s10 }
  0x15   :  { %s368_s13 = scalar_lea.hbm %s538_s0, 64 }
  0x16   :  { %p369_p8 = scmp.ne.s32.totalorder %s538_s0, %s368_s13  ;;  %p372_p9 = scmp.lt.u32.totalorder %s368_s13, %s538_s0 }
  0x18   :  { %p374_p10 = pnand %p372_p9, %p369_p8 }
  0x1a   :  { %377 = shalt.err (!%p374_p10)
}
  0x1b   :  { %s378_s1 = scalar_lea.vmem %s20_s8, 64  ;;  %p383_p12 = scmp.lt.s32.totalorder %s20_s8, %s20_s8 }
  0x1c   :  { %p379_p11 = scmp.ne.s32.totalorder %s20_s8, %s378_s1  ;;  %p384_p13 = scmp.lt.s32.totalorder %s378_s1, %s378_s1 }
  0x1e   :  { %p385_p0 = por %p384_p13, %p383_p12 }
  0x20   :  { %p386_p1 = pnand %p385_p0, %p379_p11 }
  0x22   :  { %389 = shalt.err (!%p386_p1)
}
  0x23   :  { %22 = dma.hbm_to_vmem [thread:$0]  %s538_s0, 64, %s20_s8, [#allocation3]  }
  0x24   :  { %s390_s22 = scalar_lea.hbm %s541_s3, 1024 }
  0x25   :  { %p391_p2 = scmp.ne.s32.totalorder %s541_s3, %s390_s22  ;;  %p394_p3 = scmp.lt.u32.totalorder %s390_s22, %s541_s3 }
  0x27   :  { %p396_p4 = pnand %p394_p3, %p391_p2 }
  0x29   :  { %399 = shalt.err (!%p396_p4)
}
  0x2a   :  { %s400_s27 = scalar_lea.vmem %s43_s10, 1024  ;;  %p405_p6 = scmp.lt.s32.totalorder %s43_s10, %s43_s10 }
  0x2b   :  { %p401_p5 = scmp.ne.s32.totalorder %s43_s10, %s400_s27  ;;  %p406_p7 = scmp.lt.s32.totalorder %s400_s27, %s400_s27 }
  0x2d   :  { %p407_p8 = por %p406_p7, %p405_p6 }
  0x2f   :  { %p408_p9 = pnand %p407_p8, %p401_p5 }
  0x31   :  { %411 = shalt.err (!%p408_p9)
}
  0x32   :  { %48 = dma.hbm_to_vmem [thread:$0]  %s541_s3, 1024, %s43_s10, [#allocation6], %s441_s28, %s441_s28, %s442_s29  }
  0x33   :  { %434 = dma.done.wait [#allocation3], 64  }
  0x34   :  { %435 = vsyncadd [#allocation3], 4294967232 }
  0x35   :  { %436 = dma.done.wait [#allocation6], 1280  }
  0x36   :  { %437 = vsyncadd [#allocation6], 4294966016  ;;  %v445_v0 = vmov 0.0   ;;  %vm446_vm0 = vmmov 0   ;;  %v330_v1 = vld [vmem:[#allocation5] sm:$0xff]   ;;  %v331_v2 = vld [vmem:[#allocation5 + $0x8] sm:$0xff]  }
  0x37   :  { %294 = vmatprep.subr.bf16.mxu0 %v445_v0  ;;  %298 = vmatprep.mubr.msk.bf16.mxu0 %vm446_vm0, %v445_v0  ;;  %v332_v3 = vld [vmem:[#allocation7] sm:$0xff]   ;;  %v333_v4 = vld [vmem:[#allocation7 + $0x8] sm:$0xff]   ;;  %vm85_vm1 = vcmask 261120   ;;  %v334_v6 = vld [vmem:[#allocation7 + $0x10] sm:$0xff]  }
  0x38   :  { %302 = vmatprep.subr.bf16.mxu1 %v445_v0  ;;  %318 = vmatprep.mubr.msk.bf16.mxu1 %vm446_vm0, %v445_v0  ;;  %v61_v5 = vld [vmem:[#allocation2] sm:$0xf]  ;;  %v335_v7 = vld [vmem:[#allocation7 + $0x18] sm:$0xff]   ;;  %v336_v8 = vld [vmem:[#allocation7 + $0x20] sm:$0xff]  }
  0x39   :  { %295 = vmatpush3.bf16.msra.mxu0 %v330_v1  ;;  %303 = vmatpush3.bf16.msra.mxu1 %v332_v3  ;;  %v337_v9 = vld [vmem:[#allocation7 + $0x28] sm:$0xff]   ;;  %v338_v10 = vld [vmem:[#allocation7 + $0x30] sm:$0xff]   ;;  %v339_v11 = vld [vmem:[#allocation7 + $0x38] sm:$0xff]  }
  0x3a   :  { %296 = vmatprep.subr.bf16.mxu0 %v445_v0  ;;  %304 = vmatprep.subr.bf16.mxu1 %v445_v0  ;;  %v269_v12 = vld [vmem:[%s540_s2] ss:$0 sm:$0xff]  ;;  %s447_s2 = smov [#allocation8]  }
  0x3b   :  { %v273_v20 = vld [vmem:[%s542_s4] ss:$0 sm:$0xff]  ;;  %s259_s7 = sshll.u32 %s447_s2, 4  ;;  %s260_s7 = int_to_ptr.vmem [resolvable:$true] %s259_s7 }
  0x3c   :  { %s412_s4 = scalar_lea.vmem %s260_s7, 128  ;;  %p417_p11 = scmp.lt.s32.totalorder %s260_s7, %s260_s7 }
  0x3d   :  { %297 = vmatpush3.bf16.msra.mxu0 %v331_v2  ;;  %305 = vmatpush3.bf16.msra.mxu1 %v333_v4  ;;  %p413_p10 = scmp.ne.s32.totalorder %s260_s7, %s412_s4  ;;  %p418_p12 = scmp.lt.s32.totalorder %s412_s4, %s412_s4 }
  0x3e   :  { %306 = vmatprep.subr.bf16.mxu1 %v445_v0 }
  0x3f   :  { %p419_p13 = por %p418_p12, %p417_p11 }
  0x40   :  { %299 = vmatmul.mubr.msk.bf16.vlgmr.msra.gmra.mrb[0].mxu0 %vm85_vm1, %v61_v5 }
  0x41   :  { %307 = vmatpush3.bf16.msra.mxu1 %v334_v6  ;;  %p420_p0 = pnand %p419_p13, %p413_p10 }
  0x42   :  { %308 = vmatprep.subr.bf16.mxu1 %v445_v0 }
  0x45   :  { %309 = vmatpush3.bf16.msra.mxu1 %v335_v7 }
  0x46   :  { %310 = vmatprep.subr.bf16.mxu1 %v445_v0 }
  0x49   :  { %311 = vmatpush3.bf16.msra.mxu1 %v336_v8 }
  0x4a   :  { %312 = vmatprep.subr.bf16.mxu1 %v445_v0 }
  0x4d   :  { %313 = vmatpush3.bf16.msra.mxu1 %v337_v9 }
  0x4e   :  { %314 = vmatprep.subr.bf16.mxu1 %v445_v0 }
  0x51   :  { %315 = vmatpush3.bf16.msra.mxu1 %v338_v10 }
  0x52   :  { %316 = vmatprep.subr.bf16.mxu1 %v445_v0 }
  0x55   :  { %317 = vmatpush3.bf16.msra.mxu1 %v339_v11 }
 0x113   :  { %v123_v13 = vpop.f32.mrb[0].mxu0 }
 0x114   :  { %v124_v14 = vadd.f32 %v269_v12, %v123_v13  ;;  %v300_v15 = vpop.f32.mrb[1].mxu0 }
 0x115   :  { %v126_v16 = vpop.f32.mrb[2].mxu0 }
 0x116   :  { %340 = vtanh.f32 %v124_v14  ;;  %v301_v17 = vpop.f32.mrb[3].mxu0 }
 0x120   :  { %v341_v18 = vpop.eup %340 }
 0x121   :  { %v130_v19 = vpack.c.bf16 %v341_v18, %v341_v18 }
 0x123   :  { %319 = vmatmul.mubr.bf16.vlgmr.msra.gmra.mrb[0].mxu1 %v130_v19 }
 0x1f6   :  { %v236_v21 = vpop.f32.mrb[0].mxu1 }
 0x1f7   :  { %v237_v22 = vadd.f32 %v273_v20, %v236_v21  ;;  %v320_v23 = vpop.f32.mrb[1].mxu1 }
 0x1f8   :  { %v239_v24 = vpop.f32.mrb[2].mxu1 }
 0x1f9   :  { %242 = vmax.xlane.f32.xlu0 %v237_v22  ;;  %v321_v25 = vpop.f32.mrb[3].mxu1 }
 0x286   :  { %v243_v26 = vpop.xlane.xlu0 %242 }
 0x287   :  { %v244_v27 = vsub.f32 %v237_v22, %v243_v26 }
 0x289   :  { %v245_v28 = vmul.f32 1.442695, %v244_v27 }
 0x28b   :  { %342 = vpow2.f32 %v245_v28 }
 0x295   :  { %v343_v29 = vpop.eup %342 }
 0x296   :  { %247 = vadd.xlane.f32.xlu0 %v343_v29 }
 0x323   :  { %v248_v30 = vpop.xlane.xlu0 %247 }
 0x324   :  { %344 = vlog2.f32 %v248_v30 }
 0x32e   :  { %v345_v31 = vpop.eup %344 }
 0x32f   :  { %v250_v32 = vmul.f32 0.6931472, %v345_v31 }
 0x331   :  { %v251_v33 = vsub.f32 %v244_v27, %v250_v32 }
 0x333   :  { %252 = vst [vmem:[#allocation8] sm:$0xff] %v251_v33 }
 0x334   :  { %423 = shalt.err (!%p420_p0)
}
 0x335   :  { %s424_s10 = scalar_lea.hbm %s543_s5, 128 }
 0x336   :  { %p425_p1 = scmp.ne.s32.totalorder %s543_s5, %s424_s10  ;;  %p428_p2 = scmp.lt.u32.totalorder %s424_s10, %s543_s5 }
 0x338   :  { %p430_p3 = pnand %p428_p2, %p425_p1 }
 0x33a   :  { %433 = shalt.err (!%p430_p3)
}
 0x33b   :  { %262 = dma.vmem_to_hbm [thread:$0]  %s260_s7, 128, %s543_s5, [#allocation4]  }
 0x33c   :  { %438 = dma.done.wait [#allocation4], 128  }
 0x33d   :  { %439 = vsyncadd [#allocation4], 4294967168 }
 0x33e   :  { %266 = vsyncpa [#allocation3], 1 }
 0x33f   :  { %267 = vsyncpa [#allocation6], 1 }
 0x340   :  { %268 = vsyncpa [#allocation4], 1 }

</bundles_post_ra>
